<compile_context>
chip_gen: v6e
topology: v6e:2x2x1
jax: 0.10.0
libtpu: 0.0.40
codegen_flags: <defaults>
</compile_context>

<pallas_src>
import functools

import jax
import jax.numpy as jnp
from jax.experimental import pallas as pl
from jax.experimental.pallas import tpu as pltpu


# ----------------------------------------------------------------------------
# helpers
# ----------------------------------------------------------------------------
def _round_up(x, m):
    return ((x + m - 1) // m) * m


def _pad2(x, shape):
    pr, pc = shape[0] - x.shape[0], shape[1] - x.shape[1]
    if pr == 0 and pc == 0:
        return x
    return jnp.pad(x, ((0, pr), (0, pc)))


# ----------------------------------------------------------------------------
# Pallas kernels: fused two-stage heads
# ----------------------------------------------------------------------------
def _obj_head_kernel(x_ref, w1_ref, b1_ref, w2_ref, b2_ref, o_ref):
    # h = relu(x @ W1 + b1)   (bf16 MXU, f32 accumulate, elementwise in f32)
    h = jnp.dot(x_ref[...], w1_ref[...], preferred_element_type=jnp.float32)
    h = jnp.maximum(h + b1_ref[...], 0.0)
    # y = h @ W2 + b2         (classifier is a plain Linear, no ReLU)
    y = jnp.dot(h.astype(w2_ref.dtype), w2_ref[...],
                preferred_element_type=jnp.float32)
    o_ref[...] = (y + b2_ref[...]).astype(o_ref.dtype)


def _rel_head_kernel(x_ref, w1_ref, b1_ref, w2_ref, b2_ref, freq_ref, o_ref,
                     *, lam):
    h = jnp.dot(x_ref[...], w1_ref[...], preferred_element_type=jnp.float32)
    h = jnp.maximum(h + b1_ref[...], 0.0)
    y = jnp.dot(h.astype(w2_ref.dtype), w2_ref[...],
                preferred_element_type=jnp.float32)
    o_ref[...] = (y + b2_ref[...] + lam * freq_ref[...]).astype(o_ref.dtype)


def _fused_head(x, w1, b1, w2, b2, freq=None, lam=1.0, tile_rows=256):
    """Fused relu(x@W1+b1)@W2+b2 (+ lam*freq) with row-tiled pipelining.

    - rows tiled by `tile_rows` (grid axis marked "parallel" -> megacore shard)
    - weights/biases use a constant block index so they stay resident in VMEM
    - all feature dims zero-padded to multiples of 128 (lane-dense stores, no
      masked vst); padded rows/cols are sliced off on return.
    """
    n, din = x.shape
    dh = w1.shape[1]
    dout = w2.shape[1]

    din_p = _round_up(din, 128)
    dh_p = _round_up(dh, 128)
    dout_p = _round_up(dout, 128)
    tn = min(tile_rows, _round_up(max(n, 1), 16))   # 16: safe for bf16 sublanes
    n_p = _round_up(max(n, 1), tn)

    xb = _pad2(x.astype(jnp.bfloat16), (n_p, din_p))
    w1b = _pad2(w1.astype(jnp.bfloat16), (din_p, dh_p))
    b1b = _pad2(b1.astype(jnp.float32), (1, dh_p))
    w2b = _pad2(w2.astype(jnp.bfloat16), (dh_p, dout_p))
    b2b = _pad2(b2.astype(jnp.float32), (1, dout_p))

    inputs = [xb, w1b, b1b, w2b, b2b]
    in_specs = [
        pl.BlockSpec((tn, din_p), lambda i: (i, 0)),      # activation: row tile
        pl.BlockSpec((din_p, dh_p), lambda i: (0, 0)),    # weights stay resident
        pl.BlockSpec((1, dh_p), lambda i: (0, 0)),
        pl.BlockSpec((dh_p, dout_p), lambda i: (0, 0)),
        pl.BlockSpec((1, dout_p), lambda i: (0, 0)),
    ]
    if freq is not None:
        fb = _pad2(freq.astype(jnp.float32), (n_p, dout_p))
        inputs.append(fb)
        in_specs.append(pl.BlockSpec((tn, dout_p), lambda i: (i, 0)))
        kernel = functools.partial(_rel_head_kernel, lam=float(lam))
    else:
        kernel = _obj_head_kernel

    flops = 2 * n_p * (din_p * dh_p + dh_p * dout_p)
    bytes_accessed = (sum(int(a.size) * a.dtype.itemsize for a in inputs)
                      + n_p * dout_p * 4)
    cost = pl.CostEstimate(flops=flops, transcendentals=0,
                           bytes_accessed=bytes_accessed)

    out = pl.pallas_call(
        kernel,
        out_shape=jax.ShapeDtypeStruct((n_p, dout_p), jnp.float32),
        grid=(n_p // tn,),
        in_specs=in_specs,
        out_specs=pl.BlockSpec((tn, dout_p), lambda i: (i, 0)),
        compiler_params=pltpu.CompilerParams(
            dimension_semantics=("parallel",),
            vmem_limit_bytes=64 * 1024 * 1024,
        ),
        cost_estimate=cost,
    )(*inputs)
    return out[:n, :dout]


# ----------------------------------------------------------------------------
# Parameter construction (deterministic, shapes follow __init__)
# ----------------------------------------------------------------------------
def _xavier(key, fan_in, fan_out):
    lim = (6.0 / (fan_in + fan_out)) ** 0.5
    return jax.random.uniform(key, (fan_in, fan_out), jnp.float32, -lim, lim)


def init_params(key, cfg):
    D = cfg["in_channels"]        # roi feature dim
    P = cfg["pooling_dim"]        # union feature dim (CONTEXT_POOLING_DIM)
    H = cfg["hidden_dim"]         # BGNN GRAPH_HIDDEN_DIM
    C = cfg["num_obj_cls"]
    R = cfg["num_rel_cls"]

    ks = jax.random.split(key, 6)
    params = {}
    # --- HetSGGplus_Context stand-in (see TODO in forward) ---
    params["ctx_obj_w"] = _xavier(ks[0], D, H)
    params["ctx_obj_b"] = jnp.zeros((1, H), jnp.float32)
    params["ctx_rel_w"] = _xavier(ks[1], P, H)
    params["ctx_rel_b"] = jnp.zeros((1, H), jnp.float32)
    # --- classifiers (build_classifier == plain Linear) ---
    params["obj_cls_w"] = _xavier(ks[2], H, C)
    params["obj_cls_b"] = jnp.zeros((1, C), jnp.float32)
    params["rel_cls_w"] = _xavier(ks[3], H, R)
    params["rel_cls_b"] = jnp.zeros((1, R), jnp.float32)
    # --- FrequencyBias: Embedding(num_obj_cls**2, num_rel_cls) ---
    params["freq_bias"] = 0.01 * jax.random.normal(ks[4], (C * C, R), jnp.float32)
    params["freq_lambda"] = 1.0   # nn.Parameter([1.0], requires_grad=False)
    return params


# ----------------------------------------------------------------------------
# Forward pass (eval mode; use_bias=True, use_obj_recls_logits=False, sgcls)
# ----------------------------------------------------------------------------
def hetsgg_predictor_forward(params, cfg, num_objs, rel_pair_idxs,
                             predict_logits_list, roi_features, union_features):
    C = cfg["num_obj_cls"]

    # per-proposal pred_labels: argmax(softmax(predict_logits)) == argmax(logits)
    obj_pred_logits = jnp.concatenate(predict_logits_list, axis=0)   # [N_obj, C]
    obj_pred_labels = jnp.argmax(obj_pred_logits, axis=-1)           # [N_obj]

    # ---- context layer + obj_classifier ------------------------------------
    # TODO(synk): HetSGGplus_Context (heterogeneous relation-aware message
    # passing + GSL pre-classifier) has no clean Pallas equivalent; stand-in is
    # a fused ReLU-MLP per entity / per relation; pre_cls_logits & relatedness
    # are omitted (training-only / relpn branch).
    refined_obj_logits = _fused_head(
        roi_features, params["ctx_obj_w"], params["ctx_obj_b"],
        params["obj_cls_w"], params["obj_cls_b"])
    # TODO(synk): use_obj_recls_logits sgdet/sgcls branch (obj_prediction_nms
    # over boxes_per_cls) is box NMS — not a Pallas op; default path uses the
    # proposals' pred_labels, so refined_obj_logits stays unused (as in torch).

    # ---- frequency-bias pair gather (flat, single gather) -------------------
    offsets, acc = [], 0
    for n in num_objs:
        offsets.append(acc)
        acc += n
    pair_idx_flat = jnp.concatenate(
        [p.astype(jnp.int32) + off for p, off in zip(rel_pair_idxs, offsets)],
        axis=0)                                                      # [N_rel, 2]
    pair_pred = obj_pred_labels[pair_idx_flat]                       # [N_rel, 2]
    freq_rows = params["freq_bias"][pair_pred[:, 0] * C + pair_pred[:, 1]]

    # ---- rel head: context stand-in + rel_classifier + freq bias (1 kernel) -
    rel_cls_logits = _fused_head(
        union_features, params["ctx_rel_w"], params["ctx_rel_b"],
        params["rel_cls_w"], params["rel_cls_b"],
        freq=freq_rows, lam=params["freq_lambda"])                   # [N_rel, R]

    # TODO(synk): training-only branches (GSL_Loss pre_rel_classify losses) are
    # not part of the eval forward path; add_losses stays empty.

    # ---- per-image splits (torch .split semantics) ---------------------------
    num_rels = [int(p.shape[0]) for p in rel_pair_idxs]
    obj_logits_split, rel_logits_split = [], []
    s = 0
    for n in num_objs:
        obj_logits_split.append(obj_pred_logits[s:s + n]); s += n
    s = 0
    for n in num_rels:
        rel_logits_split.append(rel_cls_logits[s:s + n]); s += n

    add_losses = {}
    return obj_logits_split, rel_logits_split, add_losses, None, refined_obj_logits


# ----------------------------------------------------------------------------
if __name__ == "__main__":
    cfg = dict(
        in_channels=64,     # roi feature dim
        pooling_dim=128,    # CONTEXT_POOLING_DIM (union features)
        hidden_dim=64,      # BGNN GRAPH_HIDDEN_DIM
        num_obj_cls=10,
        num_rel_cls=16,
    )

    key = jax.random.PRNGKey(0)
    kp, k1, k2, k3, k4, k5, k6 = jax.random.split(key, 7)
    params = init_params(kp, cfg)

    # two "images", 6 proposals each, 8 relation pairs each
    num_objs = [6, 6]
    n_rel_per_img = 8
    n_obj_total = sum(num_objs)
    n_rel_total = n_rel_per_img * 2

    roi_features = jax.random.normal(k1, (n_obj_total, cfg["in_channels"]),
                                     jnp.float32)
    union_features = jax.random.normal(k2, (n_rel_total, cfg["pooling_dim"]),
                                       jnp.float32)
    predict_logits_list = [
        jax.random.normal(k3, (num_objs[0], cfg["num_obj_cls"]), jnp.float32),
        jax.random.normal(k4, (num_objs[1], cfg["num_obj_cls"]), jnp.float32),
    ]
    rel_pair_idxs = [
        jax.random.randint(k5, (n_rel_per_img, 2), 0, num_objs[0], jnp.int32),
        jax.random.randint(k6, (n_rel_per_img, 2), 0, num_objs[1], jnp.int32),
    ]

    obj_dists, rel_dists, add_losses, _, refined = hetsgg_predictor_forward(
        params, cfg, num_objs, rel_pair_idxs, predict_logits_list,
        roi_features, union_features)

    for t in obj_dists + rel_dists + [refined]:
        jax.block_until_ready(t)

    assert obj_dists[0].shape == (6, cfg["num_obj_cls"])
    assert obj_dists[1].shape == (6, cfg["num_obj_cls"])
    assert rel_dists[0].shape == (8, cfg["num_rel_cls"])
    assert rel_dists[1].shape == (8, cfg["num_rel_cls"])
    assert refined.shape == (n_obj_total, cfg["num_obj_cls"])
    print("KERNEL_OK")
</pallas_src>

<mosaic_0001>
module attributes {stable_mosaic.version = 11 : i64} {
  func.func @_obj_head_kernel(%arg0: i32, %arg1: memref<16x128xbf16, #tpu.memory_space<vmem>>, %arg2: memref<128x128xbf16, #tpu.memory_space<vmem>>, %arg3: memref<1x128xf32, #tpu.memory_space<vmem>>, %arg4: memref<128x128xbf16, #tpu.memory_space<vmem>>, %arg5: memref<1x128xf32, #tpu.memory_space<vmem>>, %arg6: memref<16x128xf32, #tpu.memory_space<vmem>>) attributes {dimension_semantics = [#tpu.dimension_semantics<parallel>], iteration_bounds = array<i64: 1>, scalar_prefetch = 0 : i64, scratch_operands = 0 : i64, tpu.core_type = #tpu.core_type<tc>, window_params = [{transform_indices = @transform_0, window_bounds = array<i64: 16, 128>}, {pipeline_mode = #tpu.pipeline_mode<synchronous>, transform_indices = @transform_1, window_bounds = array<i64: 128, 128>}, {pipeline_mode = #tpu.pipeline_mode<synchronous>, transform_indices = @transform_2, window_bounds = array<i64: 1, 128>}, {pipeline_mode = #tpu.pipeline_mode<synchronous>, transform_indices = @transform_3, window_bounds = array<i64: 128, 128>}, {pipeline_mode = #tpu.pipeline_mode<synchronous>, transform_indices = @transform_4, window_bounds = array<i64: 1, 128>}, {transform_indices = @transform_5, window_bounds = array<i64: 16, 128>}]} {
    %c0 = arith.constant 0 : index
    %c0_0 = arith.constant 0 : index
    %0 = vector.load %arg1[%c0, %c0_0] : memref<16x128xbf16, #tpu.memory_space<vmem>>, vector<16x128xbf16>
    %c0_1 = arith.constant 0 : index
    %c0_2 = arith.constant 0 : index
    %1 = vector.load %arg2[%c0_1, %c0_2] : memref<128x128xbf16, #tpu.memory_space<vmem>>, vector<128x128xbf16>
    %cst = arith.constant dense<0.000000e+00> : vector<16x128xf32>
    %2 = tpu.matmul %0, %1, %cst {dimension_numbers = #tpu.dot_dimension_numbers<[1], [0], [0], [1], [0, 0, 1, 1], [], []>} : vector<16x128xbf16>, vector<128x128xbf16>, vector<16x128xf32> -> vector<16x128xf32>
    %c0_3 = arith.constant 0 : index
    %c0_4 = arith.constant 0 : index
    %3 = vector.load %arg3[%c0_3, %c0_4] : memref<1x128xf32, #tpu.memory_space<vmem>>, vector<1x128xf32>
    %4 = vector.broadcast %3 : vector<1x128xf32> to vector<16x128xf32>
    %5 = arith.addf %2, %4 : vector<16x128xf32>
    %cst_5 = arith.constant 0.000000e+00 : f32
    %6 = vector.broadcast %cst_5 : f32 to vector<16x128xf32>
    %7 = arith.maximumf %5, %6 : vector<16x128xf32>
    %8 = arith.truncf %7 : vector<16x128xf32> to vector<16x128xbf16>
    %c0_6 = arith.constant 0 : index
    %c0_7 = arith.constant 0 : index
    %9 = vector.load %arg4[%c0_6, %c0_7] : memref<128x128xbf16, #tpu.memory_space<vmem>>, vector<128x128xbf16>
    %cst_8 = arith.constant dense<0.000000e+00> : vector<16x128xf32>
    %10 = tpu.matmul %8, %9, %cst_8 {dimension_numbers = #tpu.dot_dimension_numbers<[1], [0], [0], [1], [0, 0, 1, 1], [], []>} : vector<16x128xbf16>, vector<128x128xbf16>, vector<16x128xf32> -> vector<16x128xf32>
    %c0_9 = arith.constant 0 : index
    %c0_10 = arith.constant 0 : index
    %11 = vector.load %arg5[%c0_9, %c0_10] : memref<1x128xf32, #tpu.memory_space<vmem>>, vector<1x128xf32>
    %12 = vector.broadcast %11 : vector<1x128xf32> to vector<16x128xf32>
    %13 = arith.addf %10, %12 : vector<16x128xf32>
    %c0_11 = arith.constant 0 : index
    %c0_12 = arith.constant 0 : index
    %14 = vector.load %arg6[%c0_11, %c0_12] : memref<16x128xf32, #tpu.memory_space<vmem>>, vector<16x128xf32>
    tpu.vector_store %arg6[%c0_11, %c0_12], %13 {strides = array<i32>} : memref<16x128xf32, #tpu.memory_space<vmem>>, vector<16x128xf32>,
    return
  }
  func.func @transform_0(%arg0: i32) -> (i32, i32) {
    %c0_i32 = arith.constant 0 : i32
    %c0_i32_0 = arith.constant 0 : i32
    return %arg0, %c0_i32 : i32, i32
  }
  func.func @transform_1(%arg0: i32) -> (i32, i32) {
    %c0_i32 = arith.constant 0 : i32
    %c0_i32_0 = arith.constant 0 : i32
    %c0_i32_1 = arith.constant 0 : i32
    return %c0_i32, %c0_i32_0 : i32, i32
  }
  func.func @transform_2(%arg0: i32) -> (i32, i32) {
    %c0_i32 = arith.constant 0 : i32
    %c0_i32_0 = arith.constant 0 : i32
    %c0_i32_1 = arith.constant 0 : i32
    return %c0_i32, %c0_i32_0 : i32, i32
  }
  func.func @transform_3(%arg0: i32) -> (i32, i32) {
    %c0_i32 = arith.constant 0 : i32
    %c0_i32_0 = arith.constant 0 : i32
    %c0_i32_1 = arith.constant 0 : i32
    return %c0_i32, %c0_i32_0 : i32, i32
  }
  func.func @transform_4(%arg0: i32) -> (i32, i32) {
    %c0_i32 = arith.constant 0 : i32
    %c0_i32_0 = arith.constant 0 : i32
    %c0_i32_1 = arith.constant 0 : i32
    return %c0_i32, %c0_i32_0 : i32, i32
  }
  func.func @transform_5(%arg0: i32) -> (i32, i32) {
    %c0_i32 = arith.constant 0 : i32
    %c0_i32_0 = arith.constant 0 : i32
    return %arg0, %c0_i32 : i32, i32
  }
}

</mosaic_0001>

<bundles_post_ra>
// kernel: tpu_custom_call.1
= control target key start
LH: loop header
LB: loop body
LE: loop exit
PB: predicated region body
PF: predicated region fallthrough
CT: control target
= control target key end

     0   :  { %10 = vsyncpa [#allocation3], 0  ;;  %s566_s0 = inlined_call_operand.hbm [shape: bf16[16,128], index: 0, kind: input, shape index: {}]   ;;  %s567_s1 = inlined_call_operand.hbm [shape: bf16[128,128], index: 1, kind: input, shape index: {}]   ;;  %s568_s2 = inlined_call_operand.vmem [shape: f32[1,128], index: 2, kind: input, shape index: {}]   ;;  %s569_s3 = inlined_call_operand.hbm [shape: bf16[128,128], index: 3, kind: input, shape index: {}]   ;;  %s570_s4 = inlined_call_operand.vmem [shape: f32[1,128], index: 4, kind: input, shape index: {}]   ;;  %s571_s5 = inlined_call_operand.hbm [shape: f32[16,128], index: 5, kind: output, shape index: {}]  }
   0x1   :  { %11 = vsyncpa [#allocation6], 0 }
   0x2   :  { %12 = vsyncpa [#allocation4], 0  ;;  %s508_s18 = smov [#allocation5]   ;;  %s509_s20 = smov [#allocation2]  }
   0x3   :  { %s30_s19 = sshll.u32 %s508_s18, 4  ;;  %s18_s21 = sshll.u32 %s509_s20, 4  ;;  %s31_s19 = int_to_ptr.vmem [resolvable:$true] %s30_s19  ;;  %s19_s21 = int_to_ptr.vmem [resolvable:$true] %s18_s21 }
   0x4   :  { %s430_s22 = scalar_lea.vmem %s31_s19, 1024  ;;  %p435_p1 = scmp.lt.s32.totalorder %s31_s19, %s31_s19 }
   0x5   :  { %p431_p0 = scmp.ne.s32.totalorder %s31_s19, %s430_s22  ;;  %p436_p2 = scmp.lt.s32.totalorder %s430_s22, %s430_s22 }
   0x7   :  { %p437_p3 = por %p436_p2, %p435_p1 }
   0x9   :  { %p438_p4 = pnand %p437_p3, %p431_p0 }
   0xb   :  { %441 = shalt.err (!%p438_p4)
}
   0xc   :  { %s510_s23 = smov 64   ;;  %s511_s24 = smov 4  }
   0xd   :  { %36 = dma.hbm_to_vmem [thread:$0]  %s567_s1, 1024, %s31_s19, [#allocation6], %s510_s23, %s510_s23, %s511_s24  }
   0xe   :  { %s450_s27 = scalar_lea.vmem %s19_s21, 128  ;;  %p455_p6 = scmp.lt.s32.totalorder %s19_s21, %s19_s21 }
   0xf   :  { %p451_p5 = scmp.ne.s32.totalorder %s19_s21, %s450_s27  ;;  %p456_p7 = scmp.lt.s32.totalorder %s450_s27, %s450_s27 }
  0x11   :  { %p457_p8 = por %p456_p7, %p455_p6 }
  0x13   :  { %p458_p9 = pnand %p457_p8, %p451_p5 }
  0x15   :  { %461 = shalt.err (!%p458_p9)
}
  0x16   :  { %24 = dma.hbm_to_vmem [thread:$0]  %s566_s0, 128, %s19_s21, [#allocation3], %s510_s23, %s510_s23, %s511_s24  }
  0x17   :  { %s512_s30 = smov [#allocation7]  }
  0x18   :  { %s44_s6 = sshll.u32 %s512_s30, 4  ;;  %s45_s6 = int_to_ptr.vmem [resolvable:$true] %s44_s6 }
  0x19   :  { %s470_s7 = scalar_lea.vmem %s45_s6, 1024  ;;  %p475_p11 = scmp.lt.s32.totalorder %s45_s6, %s45_s6 }
  0x1a   :  { %p471_p10 = scmp.ne.s32.totalorder %s45_s6, %s470_s7  ;;  %p476_p12 = scmp.lt.s32.totalorder %s470_s7, %s470_s7 }
  0x1c   :  { %p477_p13 = por %p476_p12, %p475_p11 }
  0x1e   :  { %p478_p0 = pnand %p477_p13, %p471_p10 }
  0x20   :  { %481 = shalt.err (!%p478_p0)
}
  0x21   :  { %50 = dma.hbm_to_vmem [thread:$0]  %s569_s3, 1024, %s45_s6, [#allocation6], %s510_s23, %s510_s23, %s511_s24  }
  0x22   :  { %502 = dma.done.wait [#allocation3], 128  }
  0x23   :  { %503 = vsyncadd [#allocation3], 4294967168 }
  0x24   :  { %504 = dma.done.wait [#allocation6], 2048  }
  0x25   :  { %505 = vsyncadd [#allocation6], 4294965248  ;;  %v513_v0 = vmov 0.0   ;;  %vm514_vm0 = vmmov 0   ;;  %v405_v1 = vld [vmem:[#allocation5 + $0x38] sm:$0xff]   ;;  %v406_v2 = vld [vmem:[#allocation5 + $0x30] sm:$0xff]  }
  0x26   :  { %355 = vmatprep.subr.bf16.mxu0 %v513_v0  ;;  %371 = vmatprep.mubr.msk.bf16.mxu0 %vm514_vm0, %v513_v0  ;;  %v407_v3 = vld [vmem:[#allocation5 + $0x28] sm:$0xff]   ;;  %v414_v4 = vld [vmem:[#allocation7 + $0x38] sm:$0xff]   ;;  %v408_v5 = vld [vmem:[#allocation5 + $0x20] sm:$0xff]   ;;  %s515_s11 = smov [#allocation8]  }
  0x27   :  { %375 = vmatprep.subr.bf16.mxu1 %v513_v0  ;;  %391 = vmatprep.mubr.msk.bf16.mxu1 %vm514_vm0, %v513_v0  ;;  %v415_v6 = vld [vmem:[#allocation7 + $0x30] sm:$0xff]   ;;  %v409_v7 = vld [vmem:[#allocation5 + $0x18] sm:$0xff]   ;;  %v416_v8 = vld [vmem:[#allocation7 + $0x28] sm:$0xff]   ;;  %s305_s12 = sshll.u32 %s515_s11, 4  ;;  %s306_s12 = int_to_ptr.vmem [resolvable:$true] %s305_s12 }
  0x28   :  { %356 = vmatpush3.bf16.msra.mxu0 %v405_v1  ;;  %376 = vmatpush3.bf16.msra.mxu1 %v414_v4  ;;  %v410_v9 = vld [vmem:[#allocation5 + $0x10] sm:$0xff]   ;;  %v417_v10 = vld [vmem:[#allocation7 + $0x20] sm:$0xff]   ;;  %v411_v11 = vld [vmem:[#allocation5 + $0x8] sm:$0xff]   ;;  %p487_p2 = scmp.lt.s32.totalorder %s306_s12, %s306_s12 }
  0x29   :  { %357 = vmatprep.subr.bf16.mxu0 %v513_v0  ;;  %377 = vmatprep.subr.bf16.mxu1 %v513_v0  ;;  %v418_v12 = vld [vmem:[#allocation7 + $0x18] sm:$0xff]   ;;  %v412_v13 = vld [vmem:[#allocation5] sm:$0xff]   ;;  %v419_v15 = vld [vmem:[#allocation7 + $0x10] sm:$0xff]  }
  0x2a   :  { %v413_v14 = vld [vmem:[#allocation2] sm:$0xff]   ;;  %v420_v16 = vld [vmem:[#allocation7 + $0x8] sm:$0xff]   ;;  %v421_v17 = vld [vmem:[#allocation7] sm:$0xff]  }
  0x2b   :  { %v318_v18 = vld [vmem:[%s568_s2] ss:$0 sm:$0xff]  ;;  %s482_s2 = scalar_lea.vmem %s306_s12, 256 }
  0x2c   :  { %358 = vmatpush3.bf16.msra.mxu0 %v406_v2  ;;  %378 = vmatpush3.bf16.msra.mxu1 %v415_v6  ;;  %v328_v28 = vld [vmem:[%s570_s4] ss:$0 sm:$0xff]  ;;  %p483_p1 = scmp.ne.s32.totalorder %s306_s12, %s482_s2  ;;  %p488_p3 = scmp.lt.s32.totalorder %s482_s2, %s482_s2 }
  0x2d   :  { %359 = vmatprep.subr.bf16.mxu0 %v513_v0  ;;  %379 = vmatprep.subr.bf16.mxu1 %v513_v0 }
  0x2e   :  { %p489_p4 = por %p488_p3, %p487_p2 }
  0x30   :  { %360 = vmatpush3.bf16.msra.mxu0 %v407_v3  ;;  %380 = vmatpush3.bf16.msra.mxu1 %v416_v8  ;;  %p490_p5 = pnand %p489_p4, %p483_p1 }
  0x31   :  { %361 = vmatprep.subr.bf16.mxu0 %v513_v0  ;;  %381 = vmatprep.subr.bf16.mxu1 %v513_v0 }
  0x34   :  { %362 = vmatpush3.bf16.msra.mxu0 %v408_v5  ;;  %382 = vmatpush3.bf16.msra.mxu1 %v417_v10 }
  0x35   :  { %363 = vmatprep.subr.bf16.mxu0 %v513_v0  ;;  %383 = vmatprep.subr.bf16.mxu1 %v513_v0 }
  0x38   :  { %364 = vmatpush3.bf16.msra.mxu0 %v409_v7  ;;  %384 = vmatpush3.bf16.msra.mxu1 %v418_v12 }
  0x39   :  { %365 = vmatprep.subr.bf16.mxu0 %v513_v0  ;;  %385 = vmatprep.subr.bf16.mxu1 %v513_v0 }
  0x3c   :  { %366 = vmatpush3.bf16.msra.mxu0 %v410_v9  ;;  %386 = vmatpush3.bf16.msra.mxu1 %v419_v15 }
  0x3d   :  { %367 = vmatprep.subr.bf16.mxu0 %v513_v0  ;;  %387 = vmatprep.subr.bf16.mxu1 %v513_v0 }
  0x40   :  { %368 = vmatpush3.bf16.msra.mxu0 %v411_v11  ;;  %388 = vmatpush3.bf16.msra.mxu1 %v420_v16 }
  0x41   :  { %369 = vmatprep.subr.bf16.mxu0 %v513_v0  ;;  %389 = vmatprep.subr.bf16.mxu1 %v513_v0 }
  0x44   :  { %370 = vmatpush3.bf16.msra.mxu0 %v412_v13  ;;  %390 = vmatpush3.bf16.msra.mxu1 %v421_v17 }
  0x47   :  { %372 = vmatmul.mubr.bf16.vlgmr.msra.gmra.mxu0 %v413_v14 }
 0x107   :  { %v176_v19 = vpop.f32.mrf.mxu0 }
 0x108   :  { %v177_v21 = vadd.f32 %v318_v18, %v176_v19 }
 0x109   :  { %v373_v20 = vpop.f32.mrf.mxu0 }
 0x10a   :  { %v183_v25 = vmax.f32 %v177_v21, 0.0 }
 0x10b   :  { %v179_v22 = vpop.f32.mrf.mxu0 }
 0x10c   :  { %v180_v23 = vadd.f32 %v318_v18, %v179_v22 }
 0x10d   :  { %v374_v24 = vpop.f32.mrf.mxu0 }
 0x10e   :  { %v184_v26 = vmax.f32 %v180_v23, 0.0 }
 0x110   :  { %v185_v27 = vpack.c.bf16 %v184_v26, %v183_v25 }
 0x112   :  { %392 = vmatmul.mubr.bf16.vlgmr.msra.gmra.mxu1 %v185_v27 }
 0x1d2   :  { %v291_v29 = vpop.f32.mrf.mxu1 }
 0x1d3   :  { %v292_v30 = vadd.f32 %v328_v28, %v291_v29 }
 0x1d4   :  { %v393_v31 = vpop.f32.mrf.mxu1 }
 0x1d5   :  { %298 = vst [vmem:[#allocation8] sm:$0xff] %v292_v30 }
 0x1d6   :  { %v294_v32 = vpop.f32.mrf.mxu1 }
 0x1d7   :  { %v295_v33 = vadd.f32 %v328_v28, %v294_v32 }
 0x1d8   :  { %v394_v34 = vpop.f32.mrf.mxu1 }
 0x1d9   :  { %299 = vst [vmem:[#allocation8 + $0x8] sm:$0xff] %v295_v33 }
 0x1da   :  { %493 = shalt.err (!%p490_p5)
}
 0x1db   :  { %s516_s13 = smov 128   ;;  %s517_s4 = smov 8  }
 0x1dc   :  { %311 = dma.vmem_to_hbm [thread:$0]  %s306_s12, 256, %s571_s5, [#allocation4], %s516_s13, %s516_s13, %s517_s4  }
 0x1dd   :  { %506 = dma.done.wait [#allocation4], 256  }
 0x1de   :  { %507 = vsyncadd [#allocation4], 4294967040 }
 0x1df   :  { %315 = vsyncpa [#allocation3], 1 }
 0x1e0   :  { %316 = vsyncpa [#allocation6], 1 }
 0x1e1   :  { %317 = vsyncpa [#allocation4], 1 }

</bundles_post_ra>
